<compile_context>
chip_gen: v5e
topology: v5e:2x2
jax: 0.10.0
libtpu: 0.0.40
codegen_flags: <defaults>
</compile_context>

<pallas_src>
import jax
import jax.numpy as jnp
from jax.experimental import pallas as pl
from jax.experimental.pallas import tpu as pltpu

NUM_AGES = 7
NUM_OCCUPS = 21
NUM_USERS = 6040
NUM_ZIPS = 3439
EMB_SIZE = 128  # embedding_size in the PyTorch module

_GROUP = 8  # rows per dense user/zip gather group (one full sublane slab)


def _userrep_kernel(idx_ref, idxv_ref, u_ref, g_ref, a_ref, o_ref, z_ref, out_ref):
    """One grid step = one (TB, 5*E) output tile.

    idx_ref  : SMEM int32 [5, B_pad]   scalar-prefetched indices (row addressing)
    idxv_ref : VMEM int32 [TB, 8]      per-tile index block (vectorized path)
    u_/g_/a_/o_/z_ref : VMEM-resident embedding tables (full extent)
    out_ref  : VMEM [TB, 5*E] output tile
    """
    tile = pl.program_id(0)
    TB = out_ref.shape[0]
    E = u_ref.shape[1]
    base = tile * TB
    out_dtype = out_ref.dtype

    # ---- Vectorized small-table gathers (whole tile at once) ---------------
    g_idx = idxv_ref[:, 1:2]   # (TB, 1) int32
    a_idx = idxv_ref[:, 2:3]
    o_idx = idxv_ref[:, 3:4]

    # gender (2 rows): broadcast select on the VPU.
    g_out = jnp.where(g_idx == 0, g_ref[0:1, :], g_ref[1:2, :])        # (TB, E)

    # age / occupation: one-hot (TB, n) @ (n, E) on the MXU.
    def onehot_matmul(idx_col, t_ref):
        n = t_ref.shape[0]
        iota = jax.lax.broadcasted_iota(jnp.int32, (TB, n), 1)
        onehot = (iota == idx_col).astype(jnp.float32)
        return jnp.dot(onehot, t_ref[...].astype(jnp.float32),
                       preferred_element_type=jnp.float32)

    a_out = onehot_matmul(a_idx, a_ref)                                # (TB, E)
    o_out = onehot_matmul(o_idx, o_ref)                                # (TB, E)

    out_ref[:, 1 * E:2 * E] = g_out.astype(out_dtype)
    out_ref[:, 2 * E:3 * E] = a_out.astype(out_dtype)
    out_ref[:, 3 * E:4 * E] = o_out.astype(out_dtype)

    # ---- user / zip: big tables, 8-row groups, dense (8, E) stores ---------
    num_groups = TB // _GROUP            # TB is a multiple of 8 (wrapper ensures)
    for grp in range(num_groups):        # statically unrolled; static store offsets
        r0 = grp * _GROUP
        # Hoist every scalar index read for this group ahead of the vector work.
        u_ids = [idx_ref[0, base + r0 + r] for r in range(_GROUP)]
        z_ids = [idx_ref[4, base + r0 + r] for r in range(_GROUP)]
        u_slab = jnp.concatenate(
            [u_ref[pl.ds(u_ids[r], 1), :] for r in range(_GROUP)], axis=0)
        z_slab = jnp.concatenate(
            [z_ref[pl.ds(z_ids[r], 1), :] for r in range(_GROUP)], axis=0)
        out_ref[r0:r0 + _GROUP, 0:E] = u_slab.astype(out_dtype)
        out_ref[r0:r0 + _GROUP, 4 * E:5 * E] = z_slab.astype(out_dtype)


def user_rep_forward(categorical_feats, user_emb, gender_emb, age_emb,
                     occup_emb, zip_emb, *, batch_tile=None):
    """Pallas equivalent of UserRep.forward.

    categorical_feats: [B, 5] int32
      col 0: user id in [1, NUM_USERS+1]  (kernel path subtracts 1, as in PyTorch)
      col 1: gender, col 2: age, col 3: occupation, col 4: zip
    returns: [B, 5*E], embeddings concatenated as user|gender|age|occup|zip.
    """
    feats = categorical_feats.astype(jnp.int32)
    B = feats.shape[0]
    E = user_emb.shape[1]
    out_dtype = user_emb.dtype
    tables = (user_emb, gender_emb, age_emb, occup_emb, zip_emb)

    # Host-side index prep: 1-based user id -> 0-based; clamp every column so a
    # bad id can never become an OOB VMEM read (PyTorch would raise instead).
    idx = jnp.stack(
        [
            jnp.clip(feats[:, 0] - 1, 0, user_emb.shape[0] - 1),
            jnp.clip(feats[:, 1], 0, gender_emb.shape[0] - 1),
            jnp.clip(feats[:, 2], 0, age_emb.shape[0] - 1),
            jnp.clip(feats[:, 3], 0, occup_emb.shape[0] - 1),
            jnp.clip(feats[:, 4], 0, zip_emb.shape[0] - 1),
        ],
        axis=0,
    )  # [5, B] -- long axis last keeps SMEM padding small.

    # Batch tile: multiple of 8; >=2 grid tiles whenever B > 8 (v7x megacore);
    # cap 512 rows (dense stores make big tiles cheap and VMEM-safe).
    if batch_tile is None:
        b8 = max(_GROUP, ((B + _GROUP - 1) // _GROUP) * _GROUP)
        if b8 <= _GROUP:
            batch_tile = _GROUP
        else:
            batch_tile = min(
                512, max(_GROUP, ((b8 // 2 + _GROUP - 1) // _GROUP) * _GROUP))
    TB = batch_tile
    assert TB % _GROUP == 0, "batch_tile must be a multiple of 8"
    B_pad = ((B + TB - 1) // TB) * TB
    if B_pad != B:
        idx = jnp.pad(idx, ((0, 0), (0, B_pad - B)))   # padded rows gather row 0

    # Second copy of the indices as a VMEM-tileable [B_pad, 8] int32 block.
    idx_vmem = jnp.pad(idx.T, ((0, 0), (0, 8 - idx.shape[0])))

    grid = (B_pad // TB,)

    def table_spec(t):
        # Full-extent block, constant block index -> table resident in VMEM
        # across all grid steps (single HBM->VMEM DMA).
        # TODO(synk): pipeline_mode=pl.Buffered(1) would halve the resident
        # table footprint (a v7x headroom concern); kept default-buffered here.
        return pl.BlockSpec(t.shape, lambda i, idx_sref: (0, 0))

    grid_spec = pltpu.PrefetchScalarGridSpec(
        num_scalar_prefetch=1,
        grid=grid,
        in_specs=[pl.BlockSpec((TB, 8), lambda i, idx_sref: (i, 0))]
        + [table_spec(t) for t in tables],
        out_specs=pl.BlockSpec((TB, 5 * E), lambda i, idx_sref: (i, 0)),
    )

    elt = jnp.dtype(out_dtype).itemsize
    # HBM traffic only: one-time table loads + output writeback + index arrays.
    bytes_accessed = (
        sum(int(t.size) * jnp.dtype(t.dtype).itemsize for t in tables)
        + B_pad * 5 * E * elt
        + int(idx.size) * 4 + int(idx_vmem.size) * 4
    )
    flops = 2 * B_pad * E * (age_emb.shape[0] + occup_emb.shape[0])  # one-hot matmuls

    out = pl.pallas_call(
        _userrep_kernel,
        out_shape=jax.ShapeDtypeStruct((B_pad, 5 * E), out_dtype),
        grid_spec=grid_spec,
        compiler_params=pltpu.CompilerParams(
            dimension_semantics=("parallel",),        # disjoint output tiles
            vmem_limit_bytes=32 * 1024 * 1024,        # tables x2 + tiles, ~12 MiB used
        ),
        cost_estimate=pl.CostEstimate(
            flops=int(flops), transcendentals=0,
            bytes_accessed=int(bytes_accessed)),
    )(idx, idx_vmem, *tables)

    return out[:B]


def _reference_forward(categorical_feats, user_emb, gender_emb, age_emb,
                       occup_emb, zip_emb):
    """Pure-JAX reference mirroring the PyTorch forward."""
    reps = [
        user_emb[categorical_feats[:, 0] - 1],
        gender_emb[categorical_feats[:, 1]],
        age_emb[categorical_feats[:, 2]],
        occup_emb[categorical_feats[:, 3]],
        zip_emb[categorical_feats[:, 4]],
    ]
    return jnp.concatenate(reps, axis=1)


if __name__ == "__main__":
    key = jax.random.PRNGKey(0)
    k_u, k_g, k_a, k_o, k_z, k_ids = jax.random.split(key, 6)

    # Deterministic "pretrained" embedding tables (shapes from __init__).
    user_emb = jax.random.normal(k_u, (NUM_USERS + 1, EMB_SIZE), jnp.float32)
    gender_emb = jax.random.normal(k_g, (2, EMB_SIZE), jnp.float32)
    age_emb = jax.random.normal(k_a, (NUM_AGES, EMB_SIZE), jnp.float32)
    occup_emb = jax.random.normal(k_o, (NUM_OCCUPS, EMB_SIZE), jnp.float32)
    zip_emb = jax.random.normal(k_z, (NUM_ZIPS, EMB_SIZE), jnp.float32)

    # Small batch of categorical features: [B, 5]; B=16 -> two (8, 640) tiles.
    B = 16
    ks = jax.random.split(k_ids, 5)
    categorical_feats = jnp.stack(
        [
            jax.random.randint(ks[0], (B,), 1, NUM_USERS + 2),  # 1-based user id
            jax.random.randint(ks[1], (B,), 0, 2),
            jax.random.randint(ks[2], (B,), 0, NUM_AGES),
            jax.random.randint(ks[3], (B,), 0, NUM_OCCUPS),
            jax.random.randint(ks[4], (B,), 0, NUM_ZIPS),
        ],
        axis=1,
    ).astype(jnp.int32)

    out = user_rep_forward(categorical_feats, user_emb, gender_emb, age_emb,
                           occup_emb, zip_emb)
    out = jax.block_until_ready(out)

    ref = _reference_forward(categorical_feats, user_emb, gender_emb, age_emb,
                             occup_emb, zip_emb)
    assert out.shape == (B, 5 * EMB_SIZE), out.shape
    assert jnp.allclose(out, ref), "Pallas output mismatch vs reference"

    print("KERNEL_OK")
</pallas_src>

<mosaic_0001>
module attributes {stable_mosaic.version = 11 : i64} {
  func.func @_userrep_kernel(%arg0: i32, %arg1: memref<5x16xi32, #tpu.memory_space<smem>>, %arg2: memref<8x8xi32, #tpu.memory_space<vmem>>, %arg3: memref<6041x128xf32, #tpu.memory_space<vmem>>, %arg4: memref<2x128xf32, #tpu.memory_space<vmem>>, %arg5: memref<7x128xf32, #tpu.memory_space<vmem>>, %arg6: memref<21x128xf32, #tpu.memory_space<vmem>>, %arg7: memref<3439x128xf32, #tpu.memory_space<vmem>>, %arg8: memref<8x640xf32, #tpu.memory_space<vmem>>) attributes {dimension_semantics = [#tpu.dimension_semantics<parallel>], iteration_bounds = array<i64: 2>, scalar_prefetch = 1 : i64, scratch_operands = 0 : i64, tpu.core_type = #tpu.core_type<tc>, window_params = [{transform_indices = @transform_0, window_bounds = array<i64: 8, 8>}, {pipeline_mode = #tpu.pipeline_mode<synchronous>, transform_indices = @transform_1, window_bounds = array<i64: 6041, 128>}, {pipeline_mode = #tpu.pipeline_mode<synchronous>, transform_indices = @transform_2, window_bounds = array<i64: 2, 128>}, {pipeline_mode = #tpu.pipeline_mode<synchronous>, transform_indices = @transform_3, window_bounds = array<i64: 7, 128>}, {pipeline_mode = #tpu.pipeline_mode<synchronous>, transform_indices = @transform_4, window_bounds = array<i64: 21, 128>}, {pipeline_mode = #tpu.pipeline_mode<synchronous>, transform_indices = @transform_5, window_bounds = array<i64: 3439, 128>}, {transform_indices = @transform_6, window_bounds = array<i64: 8, 640>}]} {
    %c8_i32 = arith.constant 8 : i32
    %0 = arith.muli %arg0, %c8_i32 : i32
    %c0 = arith.constant 0 : index
    %c1 = arith.constant 1 : index
    %1 = vector.load %arg2[%c0, %c1] : memref<8x8xi32, #tpu.memory_space<vmem>>, vector<8x1xi32>
    %c0_0 = arith.constant 0 : index
    %c2 = arith.constant 2 : index
    %2 = vector.load %arg2[%c0_0, %c2] : memref<8x8xi32, #tpu.memory_space<vmem>>, vector<8x1xi32>
    %c0_1 = arith.constant 0 : index
    %c3 = arith.constant 3 : index
    %3 = vector.load %arg2[%c0_1, %c3] : memref<8x8xi32, #tpu.memory_space<vmem>>, vector<8x1xi32>
    %c0_i32 = arith.constant 0 : i32
    %4 = vector.broadcast %c0_i32 : i32 to vector<8x1xi32>
    %5 = arith.cmpi eq, %1, %4 : vector<8x1xi32>
    %c0_2 = arith.constant 0 : index
    %c0_3 = arith.constant 0 : index
    %6 = vector.load %arg4[%c0_2, %c0_3] : memref<2x128xf32, #tpu.memory_space<vmem>>, vector<1x128xf32>
    %c1_4 = arith.constant 1 : index
    %c0_5 = arith.constant 0 : index
    %7 = vector.load %arg4[%c1_4, %c0_5] : memref<2x128xf32, #tpu.memory_space<vmem>>, vector<1x128xf32>
    %8 = vector.shape_cast %5 : vector<8x1xi1> to vector<8x1xi1>
    %9 = vector.broadcast %8 : vector<8x1xi1> to vector<8x128xi1>
    %10 = vector.shape_cast %6 : vector<1x128xf32> to vector<1x128xf32>
    %11 = vector.broadcast %10 : vector<1x128xf32> to vector<8x128xf32>
    %12 = vector.shape_cast %7 : vector<1x128xf32> to vector<1x128xf32>
    %13 = vector.broadcast %12 : vector<1x128xf32> to vector<8x128xf32>
    %14 = arith.select %9, %11, %13 : vector<8x128xi1>, vector<8x128xf32>
    %15 = tpu.iota {dimensions = array<i32: 1>} : vector<8x7xi32>
    %16 = vector.broadcast %2 : vector<8x1xi32> to vector<8x7xi32>
    %17 = arith.cmpi eq, %15, %16 : vector<8x7xi32>
    %18 = arith.extui %17 : vector<8x7xi1> to vector<8x7xi32>
    %19 = arith.sitofp %18 : vector<8x7xi32> to vector<8x7xf32>
    %c0_6 = arith.constant 0 : index
    %c0_7 = arith.constant 0 : index
    %20 = vector.load %arg5[%c0_6, %c0_7] : memref<7x128xf32, #tpu.memory_space<vmem>>, vector<7x128xf32>
    %cst = arith.constant dense<0.000000e+00> : vector<8x128xf32>
    %21 = tpu.matmul %19, %20, %cst {dimension_numbers = #tpu.dot_dimension_numbers<[1], [0], [0], [1], [0, 0, 1, 1], [], []>} : vector<8x7xf32>, vector<7x128xf32>, vector<8x128xf32> -> vector<8x128xf32>
    %22 = tpu.iota {dimensions = array<i32: 1>} : vector<8x21xi32>
    %23 = vector.broadcast %3 : vector<8x1xi32> to vector<8x21xi32>
    %24 = arith.cmpi eq, %22, %23 : vector<8x21xi32>
    %25 = arith.extui %24 : vector<8x21xi1> to vector<8x21xi32>
    %26 = arith.sitofp %25 : vector<8x21xi32> to vector<8x21xf32>
    %c0_8 = arith.constant 0 : index
    %c0_9 = arith.constant 0 : index
    %27 = vector.load %arg6[%c0_8, %c0_9] : memref<21x128xf32, #tpu.memory_space<vmem>>, vector<21x128xf32>
    %cst_10 = arith.constant dense<0.000000e+00> : vector<8x128xf32>
    %28 = tpu.matmul %26, %27, %cst_10 {dimension_numbers = #tpu.dot_dimension_numbers<[1], [0], [0], [1], [0, 0, 1, 1], [], []>} : vector<8x21xf32>, vector<21x128xf32>, vector<8x128xf32> -> vector<8x128xf32>
    %c0_11 = arith.constant 0 : index
    %c128 = arith.constant 128 : index
    %29 = vector.load %arg8[%c0_11, %c128] : memref<8x640xf32, #tpu.memory_space<vmem>>, vector<8x128xf32>
    tpu.vector_store %arg8[%c0_11, %c128], %14 {strides = array<i32>} : memref<8x640xf32, #tpu.memory_space<vmem>>, vector<8x128xf32>,
    %c0_12 = arith.constant 0 : index
    %c256 = arith.constant 256 : index
    %30 = vector.load %arg8[%c0_12, %c256] : memref<8x640xf32, #tpu.memory_space<vmem>>, vector<8x128xf32>
    tpu.vector_store %arg8[%c0_12, %c256], %21 {strides = array<i32>} : memref<8x640xf32, #tpu.memory_space<vmem>>, vector<8x128xf32>,
    %c0_13 = arith.constant 0 : index
    %c384 = arith.constant 384 : index
    %31 = vector.load %arg8[%c0_13, %c384] : memref<8x640xf32, #tpu.memory_space<vmem>>, vector<8x128xf32>
    tpu.vector_store %arg8[%c0_13, %c384], %28 {strides = array<i32>} : memref<8x640xf32, #tpu.memory_space<vmem>>, vector<8x128xf32>,
    %c0_i32_14 = arith.constant 0 : i32
    %32 = arith.addi %0, %c0_i32_14 : i32
    %c0_i32_15 = arith.constant 0 : i32
    %33 = arith.addi %32, %c0_i32_15 : i32
    %c0_16 = arith.constant 0 : index
    %34 = arith.index_cast %33 : i32 to index
    %35 = memref.load %arg1[%c0_16, %34] : memref<5x16xi32, #tpu.memory_space<smem>>
    %c0_i32_17 = arith.constant 0 : i32
    %36 = arith.addi %0, %c0_i32_17 : i32
    %c1_i32 = arith.constant 1 : i32
    %37 = arith.addi %36, %c1_i32 : i32
    %c0_18 = arith.constant 0 : index
    %38 = arith.index_cast %37 : i32 to index
    %39 = memref.load %arg1[%c0_18, %38] : memref<5x16xi32, #tpu.memory_space<smem>>
    %c0_i32_19 = arith.constant 0 : i32
    %40 = arith.addi %0, %c0_i32_19 : i32
    %c2_i32 = arith.constant 2 : i32
    %41 = arith.addi %40, %c2_i32 : i32
    %c0_20 = arith.constant 0 : index
    %42 = arith.index_cast %41 : i32 to index
    %43 = memref.load %arg1[%c0_20, %42] : memref<5x16xi32, #tpu.memory_space<smem>>
    %c0_i32_21 = arith.constant 0 : i32
    %44 = arith.addi %0, %c0_i32_21 : i32
    %c3_i32 = arith.constant 3 : i32
    %45 = arith.addi %44, %c3_i32 : i32
    %c0_22 = arith.constant 0 : index
    %46 = arith.index_cast %45 : i32 to index
    %47 = memref.load %arg1[%c0_22, %46] : memref<5x16xi32, #tpu.memory_space<smem>>
    %c0_i32_23 = arith.constant 0 : i32
    %48 = arith.addi %0, %c0_i32_23 : i32
    %c4_i32 = arith.constant 4 : i32
    %49 = arith.addi %48, %c4_i32 : i32
    %c0_24 = arith.constant 0 : index
    %50 = arith.index_cast %49 : i32 to index
    %51 = memref.load %arg1[%c0_24, %50] : memref<5x16xi32, #tpu.memory_space<smem>>
    %c0_i32_25 = arith.constant 0 : i32
    %52 = arith.addi %0, %c0_i32_25 : i32
    %c5_i32 = arith.constant 5 : i32
    %53 = arith.addi %52, %c5_i32 : i32
    %c0_26 = arith.constant 0 : index
    %54 = arith.index_cast %53 : i32 to index
    %55 = memref.load %arg1[%c0_26, %54] : memref<5x16xi32, #tpu.memory_space<smem>>
    %c0_i32_27 = arith.constant 0 : i32
    %56 = arith.addi %0, %c0_i32_27 : i32
    %c6_i32 = arith.constant 6 : i32
    %57 = arith.addi %56, %c6_i32 : i32
    %c0_28 = arith.constant 0 : index
    %58 = arith.index_cast %57 : i32 to index
    %59 = memref.load %arg1[%c0_28, %58] : memref<5x16xi32, #tpu.memory_space<smem>>
    %c0_i32_29 = arith.constant 0 : i32
    %60 = arith.addi %0, %c0_i32_29 : i32
    %c7_i32 = arith.constant 7 : i32
    %61 = arith.addi %60, %c7_i32 : i32
    %c0_30 = arith.constant 0 : index
    %62 = arith.index_cast %61 : i32 to index
    %63 = memref.load %arg1[%c0_30, %62] : memref<5x16xi32, #tpu.memory_space<smem>>
    %c0_i32_31 = arith.constant 0 : i32
    %64 = arith.addi %0, %c0_i32_31 : i32
    %c0_i32_32 = arith.constant 0 : i32
    %65 = arith.addi %64, %c0_i32_32 : i32
    %c4 = arith.constant 4 : index
    %66 = arith.index_cast %65 : i32 to index
    %67 = memref.load %arg1[%c4, %66] : memref<5x16xi32, #tpu.memory_space<smem>>
    %c0_i32_33 = arith.constant 0 : i32
    %68 = arith.addi %0, %c0_i32_33 : i32
    %c1_i32_34 = arith.constant 1 : i32
    %69 = arith.addi %68, %c1_i32_34 : i32
    %c4_35 = arith.constant 4 : index
    %70 = arith.index_cast %69 : i32 to index
    %71 = memref.load %arg1[%c4_35, %70] : memref<5x16xi32, #tpu.memory_space<smem>>
    %c0_i32_36 = arith.constant 0 : i32
    %72 = arith.addi %0, %c0_i32_36 : i32
    %c2_i32_37 = arith.constant 2 : i32
    %73 = arith.addi %72, %c2_i32_37 : i32
    %c4_38 = arith.constant 4 : index
    %74 = arith.index_cast %73 : i32 to index
    %75 = memref.load %arg1[%c4_38, %74] : memref<5x16xi32, #tpu.memory_space<smem>>
    %c0_i32_39 = arith.constant 0 : i32
    %76 = arith.addi %0, %c0_i32_39 : i32
    %c3_i32_40 = arith.constant 3 : i32
    %77 = arith.addi %76, %c3_i32_40 : i32
    %c4_41 = arith.constant 4 : index
    %78 = arith.index_cast %77 : i32 to index
    %79 = memref.load %arg1[%c4_41, %78] : memref<5x16xi32, #tpu.memory_space<smem>>
    %c0_i32_42 = arith.constant 0 : i32
    %80 = arith.addi %0, %c0_i32_42 : i32
    %c4_i32_43 = arith.constant 4 : i32
    %81 = arith.addi %80, %c4_i32_43 : i32
    %c4_44 = arith.constant 4 : index
    %82 = arith.index_cast %81 : i32 to index
    %83 = memref.load %arg1[%c4_44, %82] : memref<5x16xi32, #tpu.memory_space<smem>>
    %c0_i32_45 = arith.constant 0 : i32
    %84 = arith.addi %0, %c0_i32_45 : i32
    %c5_i32_46 = arith.constant 5 : i32
    %85 = arith.addi %84, %c5_i32_46 : i32
    %c4_47 = arith.constant 4 : index
    %86 = arith.index_cast %85 : i32 to index
    %87 = memref.load %arg1[%c4_47, %86] : memref<5x16xi32, #tpu.memory_space<smem>>
    %c0_i32_48 = arith.constant 0 : i32
    %88 = arith.addi %0, %c0_i32_48 : i32
    %c6_i32_49 = arith.constant 6 : i32
    %89 = arith.addi %88, %c6_i32_49 : i32
    %c4_50 = arith.constant 4 : index
    %90 = arith.index_cast %89 : i32 to index
    %91 = memref.load %arg1[%c4_50, %90] : memref<5x16xi32, #tpu.memory_space<smem>>
    %c0_i32_51 = arith.constant 0 : i32
    %92 = arith.addi %0, %c0_i32_51 : i32
    %c7_i32_52 = arith.constant 7 : i32
    %93 = arith.addi %92, %c7_i32_52 : i32
    %c4_53 = arith.constant 4 : index
    %94 = arith.index_cast %93 : i32 to index
    %95 = memref.load %arg1[%c4_53, %94] : memref<5x16xi32, #tpu.memory_space<smem>>
    %96 = arith.index_cast %35 : i32 to index
    %c0_54 = arith.constant 0 : index
    %97 = vector.load %arg3[%96, %c0_54] : memref<6041x128xf32, #tpu.memory_space<vmem>>, vector<1x128xf32>
    %98 = arith.index_cast %39 : i32 to index
    %c0_55 = arith.constant 0 : index
    %99 = vector.load %arg3[%98, %c0_55] : memref<6041x128xf32, #tpu.memory_space<vmem>>, vector<1x128xf32>
    %100 = arith.index_cast %43 : i32 to index
    %c0_56 = arith.constant 0 : index
    %101 = vector.load %arg3[%100, %c0_56] : memref<6041x128xf32, #tpu.memory_space<vmem>>, vector<1x128xf32>
    %102 = arith.index_cast %47 : i32 to index
    %c0_57 = arith.constant 0 : index
    %103 = vector.load %arg3[%102, %c0_57] : memref<6041x128xf32, #tpu.memory_space<vmem>>, vector<1x128xf32>
    %104 = arith.index_cast %51 : i32 to index
    %c0_58 = arith.constant 0 : index
    %105 = vector.load %arg3[%104, %c0_58] : memref<6041x128xf32, #tpu.memory_space<vmem>>, vector<1x128xf32>
    %106 = arith.index_cast %55 : i32 to index
    %c0_59 = arith.constant 0 : index
    %107 = vector.load %arg3[%106, %c0_59] : memref<6041x128xf32, #tpu.memory_space<vmem>>, vector<1x128xf32>
    %108 = arith.index_cast %59 : i32 to index
    %c0_60 = arith.constant 0 : index
    %109 = vector.load %arg3[%108, %c0_60] : memref<6041x128xf32, #tpu.memory_space<vmem>>, vector<1x128xf32>
    %110 = arith.index_cast %63 : i32 to index
    %c0_61 = arith.constant 0 : index
    %111 = vector.load %arg3[%110, %c0_61] : memref<6041x128xf32, #tpu.memory_space<vmem>>, vector<1x128xf32>
    %112 = tpu.concatenate %97, %99, %101, %103, %105, %107, %109, %111 in 0 : vector<1x128xf32>, vector<1x128xf32>, vector<1x128xf32>, vector<1x128xf32>, vector<1x128xf32>, vector<1x128xf32>, vector<1x128xf32>, vector<1x128xf32> -> vector<8x128xf32>
    %113 = arith.index_cast %67 : i32 to index
    %c0_62 = arith.constant 0 : index
    %114 = vector.load %arg7[%113, %c0_62] : memref<3439x128xf32, #tpu.memory_space<vmem>>, vector<1x128xf32>
    %115 = arith.index_cast %71 : i32 to index
    %c0_63 = arith.constant 0 : index
    %116 = vector.load %arg7[%115, %c0_63] : memref<3439x128xf32, #tpu.memory_space<vmem>>, vector<1x128xf32>
    %117 = arith.index_cast %75 : i32 to index
    %c0_64 = arith.constant 0 : index
    %118 = vector.load %arg7[%117, %c0_64] : memref<3439x128xf32, #tpu.memory_space<vmem>>, vector<1x128xf32>
    %119 = arith.index_cast %79 : i32 to index
    %c0_65 = arith.constant 0 : index
    %120 = vector.load %arg7[%119, %c0_65] : memref<3439x128xf32, #tpu.memory_space<vmem>>, vector<1x128xf32>
    %121 = arith.index_cast %83 : i32 to index
    %c0_66 = arith.constant 0 : index
    %122 = vector.load %arg7[%121, %c0_66] : memref<3439x128xf32, #tpu.memory_space<vmem>>, vector<1x128xf32>
    %123 = arith.index_cast %87 : i32 to index
    %c0_67 = arith.constant 0 : index
    %124 = vector.load %arg7[%123, %c0_67] : memref<3439x128xf32, #tpu.memory_space<vmem>>, vector<1x128xf32>
    %125 = arith.index_cast %91 : i32 to index
    %c0_68 = arith.constant 0 : index
    %126 = vector.load %arg7[%125, %c0_68] : memref<3439x128xf32, #tpu.memory_space<vmem>>, vector<1x128xf32>
    %127 = arith.index_cast %95 : i32 to index
    %c0_69 = arith.constant 0 : index
    %128 = vector.load %arg7[%127, %c0_69] : memref<3439x128xf32, #tpu.memory_space<vmem>>, vector<1x128xf32>
    %129 = tpu.concatenate %114, %116, %118, %120, %122, %124, %126, %128 in 0 : vector<1x128xf32>, vector<1x128xf32>, vector<1x128xf32>, vector<1x128xf32>, vector<1x128xf32>, vector<1x128xf32>, vector<1x128xf32>, vector<1x128xf32> -> vector<8x128xf32>
    %c0_70 = arith.constant 0 : index
    %c0_71 = arith.constant 0 : index
    %130 = vector.load %arg8[%c0_70, %c0_71] : memref<8x640xf32, #tpu.memory_space<vmem>>, vector<8x128xf32>
    tpu.vector_store %arg8[%c0_70, %c0_71], %112 {strides = array<i32>} : memref<8x640xf32, #tpu.memory_space<vmem>>, vector<8x128xf32>,
    %c0_72 = arith.constant 0 : index
    %c512 = arith.constant 512 : index
    %131 = vector.load %arg8[%c0_72, %c512] : memref<8x640xf32, #tpu.memory_space<vmem>>, vector<8x128xf32>
    tpu.vector_store %arg8[%c0_72, %c512], %129 {strides = array<i32>} : memref<8x640xf32, #tpu.memory_space<vmem>>, vector<8x128xf32>,
    return
  }
  func.func @transform_0(%arg0: i32, %arg1: memref<5x16xi32, #tpu.memory_space<smem>>) -> (i32, i32) {
    %c0_i32 = arith.constant 0 : i32
    %c0_i32_0 = arith.constant 0 : i32
    return %arg0, %c0_i32 : i32, i32
  }
  func.func @transform_1(%arg0: i32, %arg1: memref<5x16xi32, #tpu.memory_space<smem>>) -> (i32, i32) {
    %c0_i32 = arith.constant 0 : i32
    %c0_i32_0 = arith.constant 0 : i32
    %c0_i32_1 = arith.constant 0 : i32
    return %c0_i32, %c0_i32_0 : i32, i32
  }
  func.func @transform_2(%arg0: i32, %arg1: memref<5x16xi32, #tpu.memory_space<smem>>) -> (i32, i32) {
    %c0_i32 = arith.constant 0 : i32
    %c0_i32_0 = arith.constant 0 : i32
    %c0_i32_1 = arith.constant 0 : i32
    return %c0_i32, %c0_i32_0 : i32, i32
  }
  func.func @transform_3(%arg0: i32, %arg1: memref<5x16xi32, #tpu.memory_space<smem>>) -> (i32, i32) {
    %c0_i32 = arith.constant 0 : i32
    %c0_i32_0 = arith.constant 0 : i32
    %c0_i32_1 = arith.constant 0 : i32
    return %c0_i32, %c0_i32_0 : i32, i32
  }
  func.func @transform_4(%arg0: i32, %arg1: memref<5x16xi32, #tpu.memory_space<smem>>) -> (i32, i32) {
    %c0_i32 = arith.constant 0 : i32
    %c0_i32_0 = arith.constant 0 : i32
    %c0_i32_1 = arith.constant 0 : i32
    return %c0_i32, %c0_i32_0 : i32, i32
  }
  func.func @transform_5(%arg0: i32, %arg1: memref<5x16xi32, #tpu.memory_space<smem>>) -> (i32, i32) {
    %c0_i32 = arith.constant 0 : i32
    %c0_i32_0 = arith.constant 0 : i32
    %c0_i32_1 = arith.constant 0 : i32
    return %c0_i32, %c0_i32_0 : i32, i32
  }
  func.func @transform_6(%arg0: i32, %arg1: memref<5x16xi32, #tpu.memory_space<smem>>) -> (i32, i32) {
    %c0_i32 = arith.constant 0 : i32
    %c0_i32_0 = arith.constant 0 : i32
    return %arg0, %c0_i32 : i32, i32
  }
}

</mosaic_0001>

<bundles_post_ra>
// kernel: tpu_custom_call.1
= control target key start
LH: loop header
LB: loop body
LE: loop exit
PB: predicated region body
PF: predicated region fallthrough
CT: control target
= control target key end

     0   :  { %s1135_s27 = smov [#allocation3]   ;;  %s1455_s0 = inlined_call_operand.hbm [shape: s32[5,16], index: 0, kind: input, shape index: {}]   ;;  %s1456_s1 = inlined_call_operand.vmem [shape: s32[16,8], index: 1, kind: input, shape index: {}]   ;;  %s1457_s2 = inlined_call_operand.hbm [shape: f32[6041,128], index: 2, kind: input, shape index: {}]   ;;  %s1458_s3 = inlined_call_operand.hbm [shape: f32[2,128], index: 3, kind: input, shape index: {}]   ;;  %s1459_s4 = inlined_call_operand.hbm [shape: f32[7,128], index: 4, kind: input, shape index: {}]   ;;  %s1460_s5 = inlined_call_operand.hbm [shape: f32[21,128], index: 5, kind: input, shape index: {}]   ;;  %s1461_s6 = inlined_call_operand.hbm [shape: f32[3439,128], index: 6, kind: input, shape index: {}]   ;;  %s1462_s7 = inlined_call_operand.hbm [shape: f32[16,640], index: 7, kind: output, shape index: {}]  }
   0x1   :  { %1473 = sst [smem:[#allocation34_spill]] %s1456_s1  ;;  %s13_s26 = sshll.u32 %s1455_s0, 4  ;;  %s14_s26 = int_to_ptr.hbm [resolvable:$true] %s13_s26 }
   0x2   :  { %1474 = sst [smem:[#allocation35_spill]] %s1457_s2 }
   0x3   :  { %1475 = sst [smem:[#allocation36_spill]] %s1458_s3 }
   0x4   :  { %1476 = sst [smem:[#allocation37_spill]] %s1459_s4 }
   0x5   :  { %1477 = sst [smem:[#allocation38_spill]] %s1460_s5 }
   0x6   :  { %1478 = sst [smem:[#allocation39_spill]] %s1461_s6 }
   0x7   :  { %1479 = sst [smem:[#allocation40_spill]] %s1462_s7 }
   0x8   :  { %16 = dma.hbm_to_smem %s14_s26, 128, %s1135_s27, [#allocation2] }
   0x9   :  { %1101 = dma.done.wait [#allocation2], 128 }
   0xa   :  { %1102 = vsyncadd [#allocation2], 4294967168 }
   0xb   :  { %19 = sfence }
   0xc   :  { %20 = vsyncpa [#allocation5], 0 }
   0xd   :  { %21 = vsyncpa [#allocation8], 0 }
   0xe   :  { %22 = vsyncpa [#allocation11], 0 }
   0xf   :  { %23 = vsyncpa [#allocation6], 0 }
  0x10   :  { %25 = vsyncpa [#allocation6 + $0x1], 0  ;;  %s1191_s28 = smov 0   ;;  %s1193_s29 = smov 0  }
  0x11   :  { %s1195_s30 = smov 0   ;;  %s1197_s8 = smov 0  }
  0x12 LB: > { %1480 = sst [smem:[#allocation19_spill]] %s1121_s28  ;;  %s1212_s0 = sadd.s32 4294967295, %s1133_s8   ;;  %s1133_s8 = sphi %s1197_s8, %s1520_s8   ;;  %s1129_s30 = sphi %s1195_s30, %s1522_s30   ;;  %s1125_s29 = sphi %s1193_s29, %s1524_s29   ;;  %s1121_s28 = sphi %s1191_s28, %s1523_s28  }
  0x13   : > { %1481 = sst [smem:[#allocation20_spill]] %s1129_s30  ;;  %s741_s9 = sadd.s32 4294967294, %s1133_s8  }
  0x14   : > { %1482 = sst [smem:[#allocation21_spill]] %s1133_s8  ;;  %s1216_s10 = sadd.s32 1, %s1133_s8  }
  0x15   : > { %1483 = sst [smem:[#allocation22_spill]] %s1212_s0  ;;  %s169_s11 = sadd.s32 1, %s1129_s30 }
  0x16   : > { %1484 = sst [smem:[#allocation23_spill]] %s1216_s10  ;;  %s166_s12 = ssub.s32 %s1133_s8, %s1216_s10 }
  0x17   : > { %p179_p0 = scmp.ne.s32.totalorder %s1129_s30, %s1125_s29  ;;  %p167_p1 = scmp.eq.s32.totalorder %s166_s12, 0 }
  0x18   : > { %p180_p2 = scmp.eq.s32.totalorder %s1212_s0, 1  ;;  %p185_p3 = scmp.ne.s32.totalorder %s1125_s29, %s1121_s28 }
  0x19   : > { %p186_p4 = scmp.eq.s32.totalorder %s741_s9, 1  ;;  %p742_p7 = scmp.ge.s32.totalorder %s1133_s8, 1 }
  0x1a   : > { %s1227_s13 = scalar_select %p167_p1, %s1129_s30, %s169_s11  }
  0x1b   : > { %p1229_p5 = por %p180_p2, %p179_p0  ;;  %p1233_p6 = por %p186_p4, %p185_p3 }
  0x1c   : > { %1485 = sst [smem:[#allocation24_spill]] %s1227_s13  ;;  %p193_p8 = scmp.lt.s32.totalorder %s1133_s8, 3 }
  0x1d   : > { %s1486_s14 = scalar_select %p1229_p5, 1, 0 }
  0x1e   : > { %s1488_s15 = scalar_select %p1233_p6, 1, 0 }
  0x1f   : > { %1487 = sst [smem:[#allocation25_spill]] %s1486_s14  ;;  %p834_p9 = scmp.eq.s32.totalorder %s1212_s0, 0 }
  0x20   : > { %1489 = sst [smem:[#allocation26_spill]] %s1488_s15  ;;  %p1240_p10 = pnand %p742_p7, %p193_p8 }
  0x21   : > { %s1491_s3 = sld [smem:[#allocation36_spill]]  ;;  %s1136_s20 = smov [#allocation7]  }
  0x22   : > { %p814_p11 = pneg %p1240_p10  ;;  %s221_s21 = sshll.u32 %s1136_s20, 4  ;;  %s222_s21 = int_to_ptr.vmem [resolvable:$true] %s221_s21 }
  0x23   : > { %s1493_s5 = sld [smem:[#allocation38_spill]]  ;;  %s1137_s26 = smov [#allocation10]  }
  0x24   : > { %p1251_p12 = pnand %p834_p9, %p814_p11  ;;  %s244_s27 = sshll.u32 %s1137_s26, 4  ;;  %s245_s27 = int_to_ptr.vmem [resolvable:$true] %s244_s27 }
  0x25   : > { %s1494_s2 = sld [smem:[#allocation35_spill]]  ;;  %s1138_s17 = smov 128  }
  0x26   : > { %s1139_s18 = smov 8   ;;  %s1495_s4 = sld [smem:[#allocation37_spill]] }
  0x27   : > { %s219_s19 = sshll.u32 %s1491_s3, 4  ;;  %s1140_s3 = smov [#allocation4]   ;;  %s220_s19 = int_to_ptr.hbm [resolvable:$true] %s219_s19 }
  0x28   : > { %820 = dma.hbm_to_vmem [thread:$0]  (!%p1251_p12), %s220_s19, 32, %s222_s21, [#allocation8]  }
  0x29   : > { %s242_s25 = sshll.u32 %s1493_s5, 4  ;;  %s206_s19 = sshll.u32 %s1140_s3, 4  ;;  %s243_s25 = int_to_ptr.hbm [resolvable:$true] %s242_s25  ;;  %s207_s19 = int_to_ptr.vmem [resolvable:$true] %s206_s19 }
  0x2a   : > { %826 = dma.hbm_to_vmem [thread:$0]  (!%p1251_p12), %s243_s25, 384, %s245_s27, [#allocation11], %s1138_s17, %s1138_s17, %s1139_s18  }
  0x2b   : > { %s204_s12 = sshll.u32 %s1494_s2, 4  ;;  %s1141_s21 = smov [#allocation9]   ;;  %s205_s12 = int_to_ptr.hbm [resolvable:$true] %s204_s12 }
  0x2c   : > { %s231_s24 = sshll.u32 %s1495_s4, 4  ;;  %s233_s26 = sshll.u32 %s1141_s21, 4  ;;  %s232_s24 = int_to_ptr.hbm [resolvable:$true] %s231_s24  ;;  %s234_s26 = int_to_ptr.vmem [resolvable:$true] %s233_s26 }
  0x2d   : > { %817 = dma.hbm_to_vmem [thread:$0]  (!%p1251_p12), %s205_s12, 96768, %s207_s19, [#allocation5], %s1138_s17, %s1138_s17, %s1139_s18  }
  0x2e   : > { %s1496_s6 = sld [smem:[#allocation39_spill]]  ;;  %s1142_s25 = smov [#allocation12]  }
  0x2f   : > { %823 = dma.hbm_to_vmem [thread:$0]  (!%p1251_p12), %s232_s24, 128, %s234_s26, [#allocation8]  }
  0x30   : > { %s258_s27 = sshll.u32 %s1142_s25, 4  ;;  %s259_s27 = int_to_ptr.vmem [resolvable:$true] %s258_s27 }
  0x31   : > { %281 = sbr.rel (%p1240_p10) target bundleno = 322 (0x142), region = 44 }
  0x34   : > { %s256_s2 = sshll.u32 %s1496_s6, 4  ;;  %s257_s2 = int_to_ptr.hbm [resolvable:$true] %s256_s2 }
  0x35   : > { %829 = dma.hbm_to_vmem [thread:$0]  (!%p1251_p12), %s257_s2, 55040, %s259_s27, [#allocation11], %s1138_s17, %s1138_s17, %s1139_s18  }
  0x36   : > { %1104 = dma.done.wait (%p834_p9), [#allocation5], 96768  }
  0x37   : > { %1106 = vsyncadd (%p834_p9), [#allocation5], 4294870528 }
  0x38   : > { %1108 = dma.done.wait (%p834_p9), [#allocation8], 160  }
  0x39   : > { %1110 = vsyncadd (%p834_p9), [#allocation8], 4294967136 }
  0x3a   : > { %1112 = dma.done.wait (%p834_p9), [#allocation11], 55424  }
  0x3b   : > { %1114 = vsyncadd (%p834_p9), [#allocation11], 4294911872  ;;  %p331_p13 = scmp.lt.s32.totalorder %s1212_s0, 1  ;;  %v1143_v0 = vmov 2   ;;  %s1497_s1 = sld [smem:[#allocation34_spill]]  ;;  %v1144_v2 = vmov 3   ;;  %v348_v54 = vlaneseq }
  0x3c   : > { %890 = vset.pattern.permute.xlu0 %v1143_v0  ;;  %s1301_s17 = sshll.u32 %s1212_s0, 3  ;;  %v356_v3 = vld [vmem:[#allocation9] sm:$0x7f]  ;;  %vm361_vm0 = vcmask 1046528   ;;  %v393_v4 = vld [vmem:[#allocation10 + $0x10] sm:$0x1f] }
  0x3d   : > { %s332_s2 = scalar_select %p331_p13, %s1212_s0, 1  ;;  %758 = vmatpush.msk.msra.mxu0 %vm361_vm0, %v356_v3  ;;  %vm398_vm1 = vcmask 1044480   ;;  %vm541_vm2 = vcmask 1040384   ;;  %vm543_vm3 = vcmask 1041408   ;;  %vm545_vm4 = vcmask 1042432   ;;  %v392_v22 = vld [vmem:[#allocation10 + $0x8] sm:$0xff] }
  0x3e   : > { %s1305_s20 = sld [smem:[#allocation3 + %s1301_s17]]  ;;  %s1308_s23 = sadd.s32 1, %s1301_s17  ;;  %761 = vmatpush.msk.msra.mxu1 %vm398_vm1, %v393_v4  ;;  %vm547_vm5 = vcmask 1043456   ;;  %vm550_vm6 = vcmask 1045504   ;;  %v391_v35 = vld [vmem:[#allocation10] sm:$0xff]  ;;  %v1145_v47 = vmov 1  }
  0x3f   : > { %s755_s3 = sshll.u32 %s332_s2, 3  ;;  %s1311_s24 = sld [smem:[#allocation3 + %s1308_s23]]  ;;  %892 = vset.pattern.permute.xlu1 %v1145_v47  ;;  %v1146_v49 = vmov 0   ;;  %v349_v55 = vand.u32 127, %v348_v54  ;;  %vm357_vm8 = vcmask 56320   ;;  %v1147_v57 = vmov 0.0  }
  0x40   : > { %s428_s19 = sadd.s32 2, %s1301_s17  ;;  %s1317_s26 = sadd.s32 3, %s1301_s17  ;;  %416 = vmatpush.msra.mxu1 %v392_v22  ;;  %vm394_vm10 = vcmask 171008   ;;  %v893_v61 = vld [vmem:[#allocation7] ss:$0 sm:$0xff] }
  0x41   : > { %s334_s12 = scalar_lea.vmem %s1497_s1, %s755_s3  ;;  %s1314_s21 = sld [smem:[#allocation3 + %s428_s19]]  ;;  %v894_v62 = vld [vmem:[#allocation7 + $0x1] ss:$0 sm:$0xff] }
  0x42   : > { %v1296_v1 = vld [vmem:[%s334_s12] sm:$0xff]  ;;  %s1320_s9 = sld [smem:[#allocation3 + %s1317_s26]]  ;;  %s1323_s11 = sadd.s32 4, %s1301_s17  ;;  %417 = vmatpush.msra.mxu1 %v391_v35 }
  0x43   : > { %351 = vperm.xlu0 %890, %v1296_v1   ;;  %s1326_s25 = sld [smem:[#allocation3 + %s1323_s11]]  ;;  %s440_s27 = sshra.s32 %s1301_s17, 7  ;;  %vm337_vm7 = vcmp.eq.s32.totalorder %v1296_v1, 0 }
  0x44   : > { %s1330_s2 = sadd.s32 5, %s1301_s17  ;;  %s448_s3 = sshra.s32 %s1308_s23, 7  ;;  %v340_v50 = vsel %vm337_vm7, 1, %v1146_v49 }
  0x45   : > { %s1334_s16 = sld [smem:[#allocation3 + %s1330_s2]]  ;;  %s456_s22 = sshra.s32 %s428_s19, 7  ;;  %342 = vperm.xlu1 %892, %v340_v50  }
  0x46   : > { %s1337_s12 = sadd.s32 6, %s1301_s17  ;;  %s774_s18 = sshll.u32 %s440_s27, 7 }
  0x47   : > { %s1340_s1 = sld [smem:[#allocation3 + %s1337_s12]]  ;;  %s776_s4 = sshll.u32 %s448_s3, 7 }
  0x48   : > { %s1343_s5 = sadd.s32 7, %s1301_s17  ;;  %s778_s6 = sshll.u32 %s456_s22, 7 }
  0x49   : > { %1498 = sst [smem:[#allocation27_spill]] %s1326_s25  ;;  %s775_s13 = sadd.s32 512, %s774_s18 }
  0x4a   : > { %s445_s30 = sand.u32 127, %s1301_s17  ;;  %s777_s10 = sadd.s32 512, %s776_s4 }
  0x4b   : > { %891 = vset.pattern.permute.xlu0 %v1144_v2  ;;  %1499 = sst [smem:[#allocation28_spill]] %s1334_s16  ;;  %s453_s15 = sand.u32 127, %s1308_s23 }
  0x4c   : > { %386 = vperm.xlu0 %891, %v1296_v1   ;;  %s779_s28 = sadd.s32 512, %s778_s6  ;;  %s461_s8 = sand.u32 127, %s428_s19 }
  0x4d   : > { %1500 = sst [smem:[#allocation29_spill]] %s1340_s1  ;;  %s446_s7 = sadd.s32 %s775_s13, %s445_s30 }
  0x4e   : > { %s464_s14 = sshra.s32 %s1317_s26, 7  ;;  %s1349_s27 = sld [smem:[#allocation3 + %s1343_s5]] }
  0x4f   : > { %s454_s3 = sadd.s32 %s777_s10, %s453_s15  ;;  %s462_s0 = sadd.s32 %s779_s28, %s461_s8 }
  0x50   : > { %s472_s1 = sshra.s32 %s1323_s11, 7  ;;  %s1352_s22 = sld [smem:[#allocation3 + %s446_s7]] }
  0x51   : > { %s780_s18 = sshll.u32 %s464_s14, 7  ;;  %s1354_s17 = sld [smem:[#allocation3 + %s454_s3]] }
  0x52   : > { %s480_s4 = sshra.s32 %s1330_s2, 7  ;;  %s1357_s6 = sld [smem:[#allocation3 + %s462_s0]] }
  0x53   : > { %s782_s23 = sshll.u32 %s472_s1, 7  ;;  %s781_s30 = sadd.s32 512, %s780_s18 }
  0x54   : > { %1501 = sst [smem:[#allocation30_spill]] %s1349_s27  ;;  %s488_s13 = sshra.s32 %s1337_s12, 7 }
  0x55   : > { %s469_s19 = sand.u32 127, %s1317_s26  ;;  %s784_s27 = sshll.u32 %s480_s4, 7 }
  0x56   : > { %1502 = sst [smem:[#allocation31_spill]] %s1352_s22  ;;  %s783_s16 = sadd.s32 512, %s782_s23 }
  0x57   : > { %1503 = sst [smem:[#allocation32_spill]] %s1354_s17  ;;  %s496_s10 = sshra.s32 %s1343_s5, 7 }
  0x58   : > { %1504 = sst [smem:[#allocation33_spill]] %s1357_s6  ;;  %s477_s28 = sand.u32 127, %s1323_s11 }
  0x59   : > { %s786_s8 = sshll.u32 %s488_s13, 7  ;;  %s785_s7 = sadd.s32 512, %s784_s27 }
  0x5a   : > { %s485_s15 = sand.u32 127, %s1330_s2  ;;  %s470_s14 = sadd.s32 %s781_s30, %s469_s19 }
  0x5b   : > { %s788_s3 = sshll.u32 %s496_s10, 7  ;;  %s787_s17 = sadd.s32 512, %s786_s8 }
  0x5c   : > { %s493_s22 = sand.u32 127, %s1337_s12  ;;  %s478_s25 = sadd.s32 %s783_s16, %s477_s28 }
  0x5d   : > { %s486_s0 = sadd.s32 %s785_s7, %s485_s15  ;;  %s789_s1 = sadd.s32 512, %s788_s3 }
  0x5e   : > { %s501_s18 = sand.u32 127, %s1343_s5  ;;  %s1366_s6 = sld [smem:[#allocation3 + %s470_s14]] }
  0x5f   : > { %s494_s26 = sadd.s32 %s787_s17, %s493_s22  ;;  %s1368_s4 = sld [smem:[#allocation3 + %s478_s25]] }
  0x60   : > { %s1370_s11 = sld [smem:[#allocation3 + %s486_s0]]  ;;  %s502_s27 = sadd.s32 %s789_s1, %s501_s18 }
  0x61   : > { %s1505_s2 = sand.u32 1, %s1125_s29   ;;  %s1376_s12 = sld [smem:[#allocation3 + %s494_s26]] }
  0x62   : > { %s1374_s23 = smul.u32 40, %s1505_s2  ;;  %s1378_s16 = sld [smem:[#allocation3 + %s502_s27]] }
  0x63   : > { %s1506_s30 = sld [smem:[#allocation27_spill]]  ;;  %s504_s22 = scalar_lea.vmem [#allocation4], %s1305_s20 }
  0x64   : > { %s1507_s5 = sld [smem:[#allocation28_spill]]  ;;  %v505_v5 = vld [vmem:[%s504_s22] sm:$0x1]  ;;  %s506_s13 = scalar_lea.vmem [#allocation4], %s1311_s24 }
  0x65   : > { %s1508_s25 = sld [smem:[#allocation29_spill]]  ;;  %v507_v6 = vld [vmem:[%s506_s13] sm:$0x1]  ;;  %s508_s19 = scalar_lea.vmem [#allocation4], %s1314_s21 }
  0x66   : > { %s1509_s17 = sld [smem:[#allocation30_spill]]  ;;  %v509_v7 = vld [vmem:[%s508_s19] sm:$0x1]  ;;  %s510_s10 = scalar_lea.vmem [#allocation4], %s1320_s9  ;;  %v521_v12 = vrot.slane %v507_v6, 7 }
  0x67   : > { %v511_v8 = vld [vmem:[%s510_s10] sm:$0x1]  ;;  %s1510_s7 = sld [smem:[#allocation31_spill]]  ;;  %v524_v13 = vrot.slane %v509_v7, 6  ;;  %s559_s0 = scalar_lea.vmem [#allocation12], %s1366_s6 }
  0x68   : > { %s1511_s14 = sld [smem:[#allocation32_spill]]  ;;  %v527_v14 = vrot.slane %v511_v8, 5  ;;  %v542_v19 = vsel %vm541_vm2, %v505_v5, %v521_v12  ;;  %v560_v25 = vld [vmem:[%s559_s0] sm:$0x1]  ;;  %s561_s1 = scalar_lea.vmem [#allocation12], %s1368_s4 }
  0x69   : > { %s512_s28 = scalar_lea.vmem [#allocation4], %s1506_s30  ;;  %s1512_s20 = sld [smem:[#allocation33_spill]]  ;;  %v544_v23 = vsel %vm543_vm3, %v542_v19, %v524_v13  ;;  %v562_v26 = vld [vmem:[%s561_s1] sm:$0x1]  ;;  %v576_v34 = vrot.slane %v560_v25, 5 }
  0x6a   : > { %v513_v9 = vld [vmem:[%s512_s28] sm:$0x1]  ;;  %s514_s8 = scalar_lea.vmem [#allocation4], %s1507_s5  ;;  %v546_v28 = vsel %vm545_vm4, %v544_v23, %v527_v14  ;;  %s563_s18 = scalar_lea.vmem [#allocation12], %s1370_s11  ;;  %v579_v38 = vrot.slane %v562_v26, 4 }
  0x6b   : > { %v515_v10 = vld [vmem:[%s514_s8] sm:$0x1]  ;;  %s516_s15 = scalar_lea.vmem [#allocation4], %s1508_s25  ;;  %v530_v16 = vrot.slane %v513_v9, 4  ;;  %s565_s26 = scalar_lea.vmem [#allocation12], %s1376_s12 }
  0x6c   : > { %v517_v11 = vld [vmem:[%s516_s15] sm:$0x1]  ;;  %s518_s3 = scalar_lea.vmem [#allocation4], %s1509_s17  ;;  %v533_v17 = vrot.slane %v515_v10, 3  ;;  %s567_s6 = scalar_lea.vmem [#allocation12], %s1378_s16 }
  0x6d   : > { %v519_v15 = vld [vmem:[%s518_s3] sm:$0x1]  ;;  %v536_v18 = vrot.slane %v517_v11, 2  ;;  %s553_s24 = scalar_lea.vmem [#allocation12], %s1510_s7  ;;  %v548_v31 = vsel %vm547_vm5, %v546_v28, %v530_v16  ;;  %s1410_s4 = scalar_lea.vmem [#allocation13], %s1374_s23 }
  0x6e   : > { %v554_v20 = vld [vmem:[%s553_s24] sm:$0x1]  ;;  %s555_s21 = scalar_lea.vmem [#allocation12], %s1511_s14  ;;  %v539_v27 = vrot.slane %v519_v15, 1  ;;  %v549_v36 = vsel %vm398_vm1, %v548_v31, %v533_v17  ;;  %s1513_s11 = sld [smem:[#allocation22_spill]] }
  0x6f   : > { %v556_v21 = vld [vmem:[%s555_s21] sm:$0x1]  ;;  %s557_s9 = scalar_lea.vmem [#allocation12], %s1512_s20  ;;  %v551_v39 = vsel %vm550_vm6, %v549_v36, %v536_v18  ;;  %s1515_s16 = sld [smem:[#allocation40_spill]] }
  0x70   : > { %v558_v24 = vld [vmem:[%s557_s9] sm:$0x1]  ;;  %v570_v32 = vrot.slane %v556_v21, 7  ;;  %v552_v43 = vsel %vm361_vm0, %v551_v39, %v539_v27  ;;  %s613_s5 = sshll.u32 %s1410_s4, 4  ;;  %s1516_s22 = sand.u32 1, %s1125_s29   ;;  %s614_s5 = int_to_ptr.vmem [resolvable:$true] %s613_s5 }
  0x71   : > { %v564_v29 = vld [vmem:[%s563_s18] sm:$0x1]  ;;  %v573_v33 = vrot.slane %v558_v24, 6  ;;  %597 = vst [vmem:[%s1410_s4] sm:$0xff] %v552_v43  ;;  %s600_s17 = scalar_lea.sflag [#allocation6], %s1516_s22 }
  0x72   : > { %v566_v30 = vld [vmem:[%s565_s26] sm:$0x1]  ;;  %v582_v40 = vrot.slane %v564_v29, 3  ;;  %v590_v42 = vsel %vm541_vm2, %v554_v20, %v570_v32 }
  0x73   : > { %v568_v37 = vld [vmem:[%s567_s6] sm:$0x1]  ;;  %v585_v41 = vrot.slane %v566_v30, 2  ;;  %v591_v44 = vsel %vm543_vm3, %v590_v42, %v573_v33 }
  0x74   : > { %v588_v45 = vrot.slane %v568_v37, 1  ;;  %v592_v46 = vsel %vm545_vm4, %v591_v44, %v576_v34  ;;  %s791_s2 = smul.u32 40, %s1513_s11 }
  0x75   : > { %v593_v48 = vsel %vm547_vm5, %v592_v46, %v579_v38  ;;  %s1077_s8 = scalar_lea.hbm %s1515_s16, 80 }
  0x76   : > { %v594_v51 = vsel %vm398_vm1, %v593_v48, %v582_v40  ;;  %s611_s30 = scalar_lea.hbm %s1515_s16, %s791_s2 }
  0x77   : > { %v595_v52 = vsel %vm550_vm6, %v594_v51, %v585_v41  ;;  %s615_s25 = sshll.u32 %s611_s30, 4  ;;  %s616_s25 = int_to_ptr.hbm [resolvable:$true] %s615_s25 }
  0x78   : > { %v596_v53 = vsel %vm361_vm0, %v595_v52, %v588_v45  ;;  %s1071_s13 = sshra.s32 %s616_s25, 4  ;;  %s1072_s13 = int_to_ptr.hbm [resolvable:$true] %s1071_s13 }
  0x79   : > { %598 = vst [vmem:[%s1410_s4 + $0x20] sm:$0xff] %v596_v53  ;;  %s1073_s19 = scalar_lea.hbm %s1072_s13, 40  ;;  %p1078_p3 = scmp.lt.s32.totalorder %s1072_s13, %s1515_s16 }
  0x7a   : > { %p1074_p0 = scmp.ne.s32.totalorder %s1072_s13, %s1073_s19  ;;  %p1079_p4 = scmp.lt.s32.totalorder %s1077_s8, %s1073_s19 }
  0x7c   : > { %p1075_p1 = pnand %p1074_p0, %p1229_p5  ;;  %p1080_p7 = por %p1079_p4, %p1078_p3 }
  0x7e   : > { %p1076_p2 = pneg %p1075_p1 }
  0x80   : > { %p1081_p8 = pnand %p1080_p7, %p1076_p2 }
  0xb5   : > { %v352_v56 = vpop.permute.xlu0 %351 }
  0xb6   : > { %vm353_vm9 = vcmp.eq.s32.totalorder %v349_v55, %v352_v56 }
  0xb7   : > { %v757_v58 = vsel %vm353_vm9, 1.0, %v1147_v57  ;;  %v343_v63 = vpop.permute.xlu1 %342 }
  0xb8   : > { %759 = vmatmul.msk.f32.vlgmr.msra.gmra.mxu0 %vm357_vm8, %v757_v58  ;;  %vm344_vm12 = vcmp.eq.s32.totalorder %v343_v63, 1 }
  0xb9   : > { %v347_v0 = vsel %vm344_vm12, %v893_v61, %v894_v62 }
  0xba   : > { %422 = vst [vmem:[%s1410_s4 + $0x8] sm:$0xff] %v347_v0 }
  0xbe   : > { %v387_v59 = vpop.permute.xlu0 %386 }
  0xbf   : > { %vm388_vm11 = vcmp.eq.s32.totalorder %v349_v55, %v387_v59 }
  0xc0   : > { %v760_v60 = vsel %vm388_vm11, 1.0, %v1147_v57 }
  0xc1   : > { %762 = vmatmul.msk.f32.vlgmr.msra.gmra.mxu1 %vm394_vm10, %v760_v60 }
 0x135   : > { %v382_v1 = vpop.f32.mrf.mxu0 }
 0x136   : > { %423 = vst [vmem:[%s1410_s4 + $0x10] sm:$0xff] %v382_v1 }
 0x13e   : > { %v419_v2 = vpop.f32.mrf.mxu1 }
 0x13f   : > { %424 = vst [vmem:[%s1410_s4 + $0x18] sm:$0xff] %v419_v2 }
 0x140   : > { %1084 = shalt.err (!%p1081_p8)
}
 0x141   : > { %812 = dma.vmem_to_hbm [thread:$0]  (%p1229_p5), %s614_s5, 640, %s616_s25, %s600_s17  }
 0x142 PF: > { %s1517_s14 = sld [smem:[#allocation21_spill]] }
 0x143   : > { %s1518_s20 = sld [smem:[#allocation19_spill]] }
 0x148   : > { %p844_p9 = scmp.ge.s32.totalorder %s1517_s14, 2 }
 0x149   : > { %s627_s24 = sand.u32 1, %s1518_s20  }
 0x14a   : > { %p831_p10 = pnand %p844_p9, %p1233_p6  ;;  %s628_s21 = scalar_lea.sflag [#allocation6], %s627_s24 }
 0x14c   : > { %p832_p11 = pneg %p831_p10 }
 0x14e   : > { %1116 = dma.done.wait (%p832_p11), %s628_s21, 640  }
 0x14f   : > { %1118 = vsyncadd (%p832_p11), %s628_s21, 4294966656  ;;  %s1520_s8 = sld [smem:[#allocation23_spill]]  ;;  %s1523_s28 = smov %s1125_s29 }
 0x150   : > { %s1521_s9 = sld [smem:[#allocation20_spill]] }
 0x151   : > { %s1522_s30 = sld [smem:[#allocation24_spill]] }
 0x155   : > { %p28_p12 = scmp.ge.s32.totalorder %s1520_s8, 4  }
 0x156   : > { %s1524_s29 = smov %s1521_s9 }
 0x157   :  { %30 = sbr.rel (!%p28_p12) target bundleno = 18 (0x12), region = 116 }
 0x15c   :  { %634 = vsyncpa [#allocation5], 1 }
 0x15d   :  { %636 = vsyncpa [#allocation5 + $0x1], 1 }
 0x15e   :  { %637 = vsyncpa [#allocation8], 1 }
 0x15f   :  { %638 = vsyncpa [#allocation11], 1 }
 0x160   :  { %639 = vsyncpa [#allocation6], 1 }
 0x161   :  { %641 = vsyncpa [#allocation6 + $0x1], 1 }

</bundles_post_ra>
